<compile_context>
chip_gen: v5e
topology: v5e:2x2
jax: 0.10.0
libtpu: 0.0.40
codegen_flags: <defaults>
</compile_context>

<pallas_src>
import functools

import jax
import jax.numpy as jnp
from jax.experimental import pallas as pl
from jax.experimental.pallas import tpu as pltpu


# ---------------------------------------------------------------------------
# Fused Pallas kernel: full 2-layer GCN encoder forward for one output row tile
# ---------------------------------------------------------------------------
def _encoder_fused_kernel(a_ref, x_ref, w1_ref, b1_ref, w2_ref, b2_ref, o_ref):
    # a_ref:  (N, N)   bf16  full normalized adjacency (grid-invariant, resident)
    # x_ref:  (N, F)   bf16  node features             (grid-invariant, resident)
    # w1_ref: (F, H)   bf16 ; b1_ref: (1, H) f32
    # w2_ref: (H, H)   bf16 ; b2_ref: (1, H) f32
    # o_ref:  (tm, H)  f32   this row tile of the final output
    tm = o_ref.shape[0]

    # ----- Layer 1 over ALL nodes (every output row needs all of h1@W2). -----
    # Recomputed per row tile so the grid axis stays "parallel" (megacore split
    # on v7x); at these sizes the duplicated work is a few MFLOP.
    xw1 = jnp.dot(x_ref[...], w1_ref[...], preferred_element_type=jnp.float32)
    h1 = jnp.dot(a_ref[...], xw1.astype(jnp.bfloat16),
                 preferred_element_type=jnp.float32)
    h1 = jnp.maximum(h1 + b1_ref[...], 0.0)              # (N, H) f32, VMEM-resident

    # TODO(synk): F.dropout in training mode not implemented (identity in eval).

    # ----- Layer 2: only this row block of the output. -----------------------
    xw2 = jnp.dot(h1.astype(jnp.bfloat16), w2_ref[...],
                  preferred_element_type=jnp.float32)     # (N, H) f32
    row0 = pl.multiple_of(pl.program_id(0) * tm, tm)
    a_blk = a_ref[pl.ds(row0, tm), :]                     # (tm, N) bf16, aligned slice
    h2 = jnp.dot(a_blk, xw2.astype(jnp.bfloat16),
                 preferred_element_type=jnp.float32)      # (tm, H) f32
    o_ref[...] = jnp.maximum(h2 + b2_ref[...], 0.0).astype(o_ref.dtype)


# ---------------------------------------------------------------------------
# Graph preprocessing (plain JAX glue): dense symmetric-normalized adjacency
# ---------------------------------------------------------------------------
def build_normalized_adjacency(edge_index, num_nodes):
    # Add self-loops (GCNConv default add_self_loops=True).
    loops = jnp.stack([jnp.arange(num_nodes), jnp.arange(num_nodes)])
    ei = jnp.concatenate([edge_index, loops], axis=1)
    row, col = ei[0], ei[1]  # message flows row(src) -> col(dst)
    deg = jnp.zeros((num_nodes,), jnp.float32).at[col].add(1.0)
    dinv = jnp.where(deg > 0, 1.0 / jnp.sqrt(deg), 0.0)
    norm = dinv[row] * dinv[col]
    # A_norm[dst, src] = norm  so that  out = A_norm @ X aggregates source features.
    a_norm = jnp.zeros((num_nodes, num_nodes), jnp.float32).at[col, row].add(norm)
    return a_norm


# ---------------------------------------------------------------------------
# Encoder forward (single fused pallas_call)
# ---------------------------------------------------------------------------
def encoder_forward(x, edge_index, params, *, tm=128):
    N, F_in = x.shape
    H = params["w1"].shape[1]
    tm = min(tm, N)
    assert N % tm == 0, "N must be a multiple of the row tile tm"

    a_norm = build_normalized_adjacency(edge_index, N)

    # bf16 MXU inputs, f32 accumulation / epilogue inside the kernel.
    a_bf = a_norm.astype(jnp.bfloat16)
    x_bf = x.astype(jnp.bfloat16)
    w1_bf = params["w1"].astype(jnp.bfloat16)
    w2_bf = params["w2"].astype(jnp.bfloat16)
    b1 = params["b1"].reshape(1, H).astype(jnp.float32)
    b2 = params["b2"].reshape(1, H).astype(jnp.float32)

    grid = (N // tm,)
    flops = 2 * N * F_in * H + 2 * N * H * H + 4 * N * N * H
    bytes_accessed = (
        2 * N * N                   # A_norm bf16
        + 2 * N * F_in              # X bf16
        + 2 * (F_in * H + H * H)    # weights bf16
        + 4 * 2 * H                 # biases f32
        + 4 * N * H                 # output f32
    )

    return pl.pallas_call(
        _encoder_fused_kernel,
        out_shape=jax.ShapeDtypeStruct((N, H), jnp.float32),
        grid_spec=pl.GridSpec(
            grid=grid,
            in_specs=[
                pl.BlockSpec((N, N), lambda i: (0, 0)),      # A_norm (resident)
                pl.BlockSpec((N, F_in), lambda i: (0, 0)),   # X       (resident)
                pl.BlockSpec((F_in, H), lambda i: (0, 0)),   # W1
                pl.BlockSpec((1, H), lambda i: (0, 0)),      # b1
                pl.BlockSpec((H, H), lambda i: (0, 0)),      # W2
                pl.BlockSpec((1, H), lambda i: (0, 0)),      # b2
            ],
            out_specs=pl.BlockSpec((tm, H), lambda i: (i, 0)),
        ),
        compiler_params=pltpu.CompilerParams(
            dimension_semantics=("parallel",),
        ),
        cost_estimate=pl.CostEstimate(
            flops=flops, transcendentals=0, bytes_accessed=bytes_accessed
        ),
    )(a_bf, x_bf, w1_bf, b1, w2_bf, b2)


def init_encoder_params(key, nfeat, nhid):
    k1, k2 = jax.random.split(key)
    # Glorot-uniform init (matches GCNConv param shapes; biases zero as in GCNConv).
    lim1 = (6.0 / (nfeat + nhid)) ** 0.5
    lim2 = (6.0 / (nhid + nhid)) ** 0.5
    return {
        "w1": jax.random.uniform(k1, (nfeat, nhid), jnp.float32, -lim1, lim1),
        "b1": jnp.zeros((nhid,), jnp.float32),
        "w2": jax.random.uniform(k2, (nhid, nhid), jnp.float32, -lim2, lim2),
        "b2": jnp.zeros((nhid,), jnp.float32),
    }


if __name__ == "__main__":
    N, NFEAT, NHID, E = 256, 64, 32, 512
    TM = 128  # row tile over output nodes (grid=(2,) -> splits across v7x's 2 TCs)

    key = jax.random.PRNGKey(0)
    kx, ke, kp = jax.random.split(key, 3)

    x = jax.random.normal(kx, (N, NFEAT), jnp.float32)
    src = jax.random.randint(ke, (E,), 0, N)
    dst = jax.random.randint(jax.random.fold_in(ke, 1), (E,), 0, N)
    # Undirected graph: include both directions (standard for GCN inputs).
    edge_index = jnp.concatenate(
        [jnp.stack([src, dst]), jnp.stack([dst, src])], axis=1
    ).astype(jnp.int32)

    params = init_encoder_params(kp, NFEAT, NHID)

    fwd = jax.jit(functools.partial(encoder_forward, tm=TM))
    out = fwd(x, edge_index, params)
    jax.block_until_ready(out)
    assert out.shape == (N, NHID)

    # Reference emulating the kernel's numerics (bf16 MXU inputs, f32 accumulate).
    a32 = build_normalized_adjacency(edge_index, N)
    a_bf = a32.astype(jnp.bfloat16)
    x_bf = x.astype(jnp.bfloat16)
    w1_bf = params["w1"].astype(jnp.bfloat16)
    w2_bf = params["w2"].astype(jnp.bfloat16)
    b1 = params["b1"].reshape(1, NHID)
    b2 = params["b2"].reshape(1, NHID)

    xw1 = jnp.dot(x_bf, w1_bf, preferred_element_type=jnp.float32)
    h1 = jnp.maximum(
        jnp.dot(a_bf, xw1.astype(jnp.bfloat16), preferred_element_type=jnp.float32)
        + b1,
        0.0,
    )
    xw2 = jnp.dot(h1.astype(jnp.bfloat16), w2_bf, preferred_element_type=jnp.float32)
    ref = jnp.maximum(
        jnp.dot(a_bf, xw2.astype(jnp.bfloat16), preferred_element_type=jnp.float32)
        + b2,
        0.0,
    )
    assert jnp.allclose(out, ref, atol=1e-2, rtol=1e-2)

    print("KERNEL_OK")
</pallas_src>

<mosaic_0001>
module attributes {stable_mosaic.version = 11 : i64} {
  func.func @_encoder_fused_kernel(%arg0: i32, %arg1: memref<256x256xbf16, #tpu.memory_space<vmem>>, %arg2: memref<256x64xbf16, #tpu.memory_space<vmem>>, %arg3: memref<64x32xbf16, #tpu.memory_space<vmem>>, %arg4: memref<1x32xf32, #tpu.memory_space<vmem>>, %arg5: memref<32x32xbf16, #tpu.memory_space<vmem>>, %arg6: memref<1x32xf32, #tpu.memory_space<vmem>>, %arg7: memref<128x32xf32, #tpu.memory_space<vmem>>) attributes {dimension_semantics = [#tpu.dimension_semantics<parallel>], iteration_bounds = array<i64: 2>, scalar_prefetch = 0 : i64, scratch_operands = 0 : i64, tpu.core_type = #tpu.core_type<tc>, window_params = [{pipeline_mode = #tpu.pipeline_mode<synchronous>, transform_indices = @transform_0, window_bounds = array<i64: 256, 256>}, {pipeline_mode = #tpu.pipeline_mode<synchronous>, transform_indices = @transform_1, window_bounds = array<i64: 256, 64>}, {pipeline_mode = #tpu.pipeline_mode<synchronous>, transform_indices = @transform_2, window_bounds = array<i64: 64, 32>}, {pipeline_mode = #tpu.pipeline_mode<synchronous>, transform_indices = @transform_3, window_bounds = array<i64: 1, 32>}, {pipeline_mode = #tpu.pipeline_mode<synchronous>, transform_indices = @transform_4, window_bounds = array<i64: 32, 32>}, {pipeline_mode = #tpu.pipeline_mode<synchronous>, transform_indices = @transform_5, window_bounds = array<i64: 1, 32>}, {transform_indices = @transform_6, window_bounds = array<i64: 128, 32>}]} {
    %c0 = arith.constant 0 : index
    %c0_0 = arith.constant 0 : index
    %0 = vector.load %arg2[%c0, %c0_0] : memref<256x64xbf16, #tpu.memory_space<vmem>>, vector<256x64xbf16>
    %c0_1 = arith.constant 0 : index
    %c0_2 = arith.constant 0 : index
    %1 = vector.load %arg3[%c0_1, %c0_2] : memref<64x32xbf16, #tpu.memory_space<vmem>>, vector<64x32xbf16>
    %cst = arith.constant dense<0.000000e+00> : vector<256x32xf32>
    %2 = tpu.matmul %0, %1, %cst {dimension_numbers = #tpu.dot_dimension_numbers<[1], [0], [0], [1], [0, 0, 1, 1], [], []>} : vector<256x64xbf16>, vector<64x32xbf16>, vector<256x32xf32> -> vector<256x32xf32>
    %c0_3 = arith.constant 0 : index
    %c0_4 = arith.constant 0 : index
    %3 = vector.load %arg1[%c0_3, %c0_4] : memref<256x256xbf16, #tpu.memory_space<vmem>>, vector<256x256xbf16>
    %4 = arith.truncf %2 : vector<256x32xf32> to vector<256x32xbf16>
    %cst_5 = arith.constant dense<0.000000e+00> : vector<256x32xf32>
    %5 = tpu.matmul %3, %4, %cst_5 {dimension_numbers = #tpu.dot_dimension_numbers<[1], [0], [0], [1], [0, 0, 1, 1], [], []>} : vector<256x256xbf16>, vector<256x32xbf16>, vector<256x32xf32> -> vector<256x32xf32>
    %c0_6 = arith.constant 0 : index
    %c0_7 = arith.constant 0 : index
    %6 = vector.load %arg4[%c0_6, %c0_7] : memref<1x32xf32, #tpu.memory_space<vmem>>, vector<1x32xf32>
    %7 = vector.broadcast %6 : vector<1x32xf32> to vector<256x32xf32>
    %8 = arith.addf %5, %7 : vector<256x32xf32>
    %cst_8 = arith.constant 0.000000e+00 : f32
    %9 = vector.broadcast %cst_8 : f32 to vector<256x32xf32>
    %10 = arith.maximumf %8, %9 : vector<256x32xf32>
    %11 = arith.truncf %10 : vector<256x32xf32> to vector<256x32xbf16>
    %c0_9 = arith.constant 0 : index
    %c0_10 = arith.constant 0 : index
    %12 = vector.load %arg5[%c0_9, %c0_10] : memref<32x32xbf16, #tpu.memory_space<vmem>>, vector<32x32xbf16>
    %cst_11 = arith.constant dense<0.000000e+00> : vector<256x32xf32>
    %13 = tpu.matmul %11, %12, %cst_11 {dimension_numbers = #tpu.dot_dimension_numbers<[1], [0], [0], [1], [0, 0, 1, 1], [], []>} : vector<256x32xbf16>, vector<32x32xbf16>, vector<256x32xf32> -> vector<256x32xf32>
    %c128_i32 = arith.constant 128 : i32
    %14 = arith.muli %arg0, %c128_i32 : i32
    %15 = tpu.assume_multiple %14, 128 : i32
    %16 = arith.index_cast %15 : i32 to index
    %c0_12 = arith.constant 0 : index
    %17 = vector.load %arg1[%16, %c0_12] : memref<256x256xbf16, #tpu.memory_space<vmem>>, vector<128x256xbf16>
    %18 = arith.truncf %13 : vector<256x32xf32> to vector<256x32xbf16>
    %cst_13 = arith.constant dense<0.000000e+00> : vector<128x32xf32>
    %19 = tpu.matmul %17, %18, %cst_13 {dimension_numbers = #tpu.dot_dimension_numbers<[1], [0], [0], [1], [0, 0, 1, 1], [], []>} : vector<128x256xbf16>, vector<256x32xbf16>, vector<128x32xf32> -> vector<128x32xf32>
    %c0_14 = arith.constant 0 : index
    %c0_15 = arith.constant 0 : index
    %20 = vector.load %arg6[%c0_14, %c0_15] : memref<1x32xf32, #tpu.memory_space<vmem>>, vector<1x32xf32>
    %21 = vector.broadcast %20 : vector<1x32xf32> to vector<128x32xf32>
    %22 = arith.addf %19, %21 : vector<128x32xf32>
    %cst_16 = arith.constant 0.000000e+00 : f32
    %23 = vector.broadcast %cst_16 : f32 to vector<128x32xf32>
    %24 = arith.maximumf %22, %23 : vector<128x32xf32>
    %c0_17 = arith.constant 0 : index
    %c0_18 = arith.constant 0 : index
    %25 = vector.load %arg7[%c0_17, %c0_18] : memref<128x32xf32, #tpu.memory_space<vmem>>, vector<128x32xf32>
    tpu.vector_store %arg7[%c0_17, %c0_18], %24 {strides = array<i32>} : memref<128x32xf32, #tpu.memory_space<vmem>>, vector<128x32xf32>,
    return
  }
  func.func @transform_0(%arg0: i32) -> (i32, i32) {
    %c0_i32 = arith.constant 0 : i32
    %c0_i32_0 = arith.constant 0 : i32
    %c0_i32_1 = arith.constant 0 : i32
    return %c0_i32, %c0_i32_0 : i32, i32
  }
  func.func @transform_1(%arg0: i32) -> (i32, i32) {
    %c0_i32 = arith.constant 0 : i32
    %c0_i32_0 = arith.constant 0 : i32
    %c0_i32_1 = arith.constant 0 : i32
    return %c0_i32, %c0_i32_0 : i32, i32
  }
  func.func @transform_2(%arg0: i32) -> (i32, i32) {
    %c0_i32 = arith.constant 0 : i32
    %c0_i32_0 = arith.constant 0 : i32
    %c0_i32_1 = arith.constant 0 : i32
    return %c0_i32, %c0_i32_0 : i32, i32
  }
  func.func @transform_3(%arg0: i32) -> (i32, i32) {
    %c0_i32 = arith.constant 0 : i32
    %c0_i32_0 = arith.constant 0 : i32
    %c0_i32_1 = arith.constant 0 : i32
    return %c0_i32, %c0_i32_0 : i32, i32
  }
  func.func @transform_4(%arg0: i32) -> (i32, i32) {
    %c0_i32 = arith.constant 0 : i32
    %c0_i32_0 = arith.constant 0 : i32
    %c0_i32_1 = arith.constant 0 : i32
    return %c0_i32, %c0_i32_0 : i32, i32
  }
  func.func @transform_5(%arg0: i32) -> (i32, i32) {
    %c0_i32 = arith.constant 0 : i32
    %c0_i32_0 = arith.constant 0 : i32
    %c0_i32_1 = arith.constant 0 : i32
    return %c0_i32, %c0_i32_0 : i32, i32
  }
  func.func @transform_6(%arg0: i32) -> (i32, i32) {
    %c0_i32 = arith.constant 0 : i32
    %c0_i32_0 = arith.constant 0 : i32
    return %arg0, %c0_i32 : i32, i32
  }
}

</mosaic_0001>

<bundles_post_ra>
// kernel: mul.1
= control target key start
LH: loop header
LB: loop body
LE: loop exit
PB: predicated region body
PF: predicated region fallthrough
CT: control target
= control target key end

     0   :  { %s56_s0 = inlined_call_operand.vmem [shape: f32[1280], index: 0, kind: input, shape index: {}]   ;;  %s57_s1 = inlined_call_operand.vmem [shape: f32[1280], index: 1, kind: input, shape index: {}]   ;;  %s58_s2 = inlined_call_operand.vmem [shape: f32[1280], index: 2, kind: output, shape index: {}]  }
   0x1   :  { %v3_v0 = vld [vmem:[%s56_s0] sm:$0xff]  ;;  %v20_v2 = vld [vmem:[%s56_s0 + $0x8] sm:$0xff] }
   0x2   :  { %v4_v1 = vld [vmem:[%s57_s1] sm:$0xff]  ;;  %v21_v4 = vld [vmem:[%s57_s1 + $0x8] sm:$0xff] }
   0x3   :  { %v7_v3 = vmul.f32 %v4_v1, %v3_v0  ;;  %v16_v5 = vmul.f32 %v21_v4, %v20_v2 }
   0x5   :  { %9 = vst [vmem:[%s58_s2] sm:$0xff] %v7_v3 }
   0x6   :  { %22 = vst [vmem:[%s58_s2 + $0x8] sm:$0xff] %v16_v5 }

// kernel: encoder_forward.1
= control target key start
LH: loop header
LB: loop body
LE: loop exit
PB: predicated region body
PF: predicated region fallthrough
CT: control target
= control target key end

     0   :  { %s1859_s21 = smov 0   ;;  %s2311_s0 = inlined_call_operand.vmem [shape: bf16[256,256], index: 0, kind: input, shape index: {}]   ;;  %s2312_s1 = inlined_call_operand.vmem [shape: bf16[256,64], index: 1, kind: input, shape index: {}]   ;;  %s2313_s2 = inlined_call_operand.vmem [shape: bf16[64,32], index: 2, kind: input, shape index: {}]   ;;  %s2314_s3 = inlined_call_operand.vmem [shape: f32[1,32], index: 3, kind: input, shape index: {}]   ;;  %s2315_s4 = inlined_call_operand.vmem [shape: bf16[32,32], index: 4, kind: input, shape index: {}]   ;;  %s2316_s5 = inlined_call_operand.vmem [shape: f32[1,32], index: 5, kind: input, shape index: {}]   ;;  %s2317_s6 = inlined_call_operand.vmem [shape: f32[256,32], index: 6, kind: output, shape index: {}]  }
   0x1 LB: > { %s1406_s22 = sadd.s32 4294967295, %s1822_s21   ;;  %p1409_p0 = scmp.ge.s32.totalorder %s1822_s21, 1  ;;  %s1822_s21 = sphi %s1859_s21, %s16_s21  }
   0x2   : > { %p202_p1 = scmp.lt.s32.totalorder %s1822_s21, 3 }
   0x4   : > { %p203_p2 = pnand %p1409_p0, %p202_p1 }
   0x5   : > { %s1660_s19 = sshll.u32 (!%p203_p2), %s1406_s22, 7  ;;  %s1410_s25 = sshll.u32 (!%p203_p2), %s1406_s22, 4 }
   0x6   : > { %206 = sbr.rel (%p203_p2) target bundleno = 1184 (0x4a0), region = 44  ;;  %s2214_s24 = scalar_lea.vmem (!%p203_p2), %s2311_s0, %s1660_s19 }
   0x7   : > { %p228_p3 = scmp.lt.s32.totalorder (!%p203_p2), %s1410_s25, 31 }
   0xb   : > { %v1748_v0 = vld [vmem:[%s2313_s2 + $0x18] sm:$0xff]  ;;  %v1747_v1 = vld [vmem:[%s2313_s2 + $0x10] sm:$0xff]  ;;  %v1746_v2 = vld [vmem:[%s2313_s2 + $0x8] sm:$0xff]  ;;  %vm378_vm0 = vcmask 523264   ;;  %vm970_vm1 = vcmask 261120   ;;  %s2319_s25 = smov (!%p228_p3, %s1410_s25), 31 }
   0xc   : > { %431 = vmatpush.bf16.msra.mxu0 %v1748_v0  ;;  %1800 = vmatpush.bf16.msra.mxu1 %v1748_v0  ;;  %v1745_v3 = vld [vmem:[%s2313_s2] sm:$0xff]  ;;  %v1730_v5 = vld [vmem:[%s2312_s1 + $0x8] sm:$0xff]  ;;  %v1731_v6 = vld [vmem:[%s2312_s1 + $0x10] sm:$0xff]  ;;  %s1411_s28 = sshll.u32 %s2319_s25, 3 }
   0xd   : > { %v1729_v4 = vld [vmem:[%s2312_s1] sm:$0xff]  ;;  %v1732_v7 = vld [vmem:[%s2312_s1 + $0x18] sm:$0xff]  ;;  %v1742_v9 = vld [vmem:[%s2312_s1 + $0x68] sm:$0xff]  ;;  %s2259_s7 = scalar_lea.vmem %s2317_s6, %s1411_s28 }
   0xe   : > { %v1733_v8 = vld [vmem:[%s2312_s1 + $0x20] sm:$0xff]  ;;  %v1734_v10 = vld [vmem:[%s2312_s1 + $0x28] sm:$0xff]  ;;  %v1743_v11 = vld [vmem:[%s2312_s1 + $0x70] sm:$0xff] }
   0xf   : > { %v1735_v12 = vld [vmem:[%s2312_s1 + $0x30] sm:$0xff]  ;;  %v1744_v13 = vld [vmem:[%s2312_s1 + $0x78] sm:$0xff]  ;;  %v1737_v15 = vld [vmem:[%s2312_s1 + $0x40] sm:$0xff] }
  0x10   : > { %432 = vmatpush.bf16.msra.mxu0 %v1747_v1  ;;  %1801 = vmatpush.bf16.msra.mxu1 %v1747_v1  ;;  %v1736_v14 = vld [vmem:[%s2312_s1 + $0x38] sm:$0xff]  ;;  %v1738_v19 = vld [vmem:[%s2312_s1 + $0x48] sm:$0xff]  ;;  %v1739_v22 = vld [vmem:[%s2312_s1 + $0x50] sm:$0xff] }
  0x11   : > { %v1740_v25 = vld [vmem:[%s2312_s1 + $0x58] sm:$0xff]  ;;  %v1741_v28 = vld [vmem:[%s2312_s1 + $0x60] sm:$0xff]  ;;  %v1750_v61 = vld [vmem:[%s2311_s0 + $0x4] sm:$0xf0] }
  0x12   : > { %v1510_v60 = vld [vmem:[%s2311_s0] sm:$0xf]  ;;  %v1518_v1 = vld [vmem:[%s2311_s0 + $0x10] sm:$0xf] }
  0x13   : > { %v1511_v63 = vor.u32 %v1750_v61, %v1510_v60 }
  0x14   : > { %433 = vmatpush.bf16.msra.mxu0 %v1746_v2  ;;  %1802 = vmatpush.bf16.msra.mxu1 %v1746_v2  ;;  %v1752_v2 = vld [vmem:[%s2311_s0 + $0x14] sm:$0xf0] }
  0x18   : > { %434 = vmatpush.bf16.msra.mxu0 %v1745_v3  ;;  %1803 = vmatpush.bf16.msra.mxu1 %v1745_v3  ;;  %v1519_v3 = vor.u32 %v1752_v2, %v1518_v1  ;;  %v1590_v1 = vld [vmem:[%s2311_s0 + $0xa0] sm:$0xf]  ;;  %v1770_v2 = vld [vmem:[%s2311_s0 + $0xa4] sm:$0xf0] }
  0x1b   : > { %1492 = vmatmul.msk.bf16.vlgmr.msra.gmra.mxu0 %vm378_vm0, %v1729_v4  ;;  %1505 = vmatmul.msk.bf16.vlgmr.msra.gmra.mxu1 %vm378_vm0, %v1742_v9  ;;  %v1754_v9 = vld [vmem:[%s2311_s0 + $0x24] sm:$0xf0] }
  0x2b   : > { %1493 = vmatmul.msk.bf16.gmra.mxu0 %vm378_vm0, %v1730_v5  ;;  %1506 = vmatmul.msk.bf16.gmra.mxu1 %vm378_vm0, %v1743_v11 }
  0x3b   : > { %1494 = vmatmul.msk.bf16.gmra.mxu0 %vm378_vm0, %v1731_v6  ;;  %1507 = vmatmul.msk.bf16.gmra.mxu1 %vm378_vm0, %v1744_v13  ;;  %v1512_v13 = vld [vmem:[%s2311_s0 + $0x8] sm:$0xf0] }
  0x4b   : > { %1495 = vmatmul.msk.bf16.gmra.mxu0 %vm378_vm0, %v1732_v7 }
  0x5b   : > { %1496 = vmatmul.msk.bf16.gmra.mxu0 %vm378_vm0, %v1733_v8  ;;  %v1526_v8 = vld [vmem:[%s2311_s0 + $0x20] sm:$0xf] }
  0x5c   : > { %v1527_v11 = vor.u32 %v1754_v9, %v1526_v8 }
  0x6b   : > { %1497 = vmatmul.msk.bf16.gmra.mxu0 %vm378_vm0, %v1734_v10 }
  0x7b   : > { %1498 = vmatmul.msk.bf16.gmra.mxu0 %vm378_vm0, %v1735_v12  ;;  %v1749_v12 = vld [vmem:[%s2311_s0 + $0x4] sm:$0xf] }
  0x8b   : > { %1499 = vmatmul.msk.bf16.gmra.mxu0 %vm378_vm0, %v1736_v14 }
  0x98   : > { %v436_v16 = vpop.f32.mrf.mxu0  ;;  %v501_v30 = vpop.f32.mrf.mxu1 }
  0x9b   : > { %1500 = vmatmul.msk.bf16.gmra.mxu0 %vm378_vm0, %v1737_v15  ;;  %v1515_v15 = vor.u32 %v1749_v12, %v1512_v13  ;;  %v1598_v13 = vld [vmem:[%s2311_s0 + $0xb0] sm:$0xf] }
  0xa0   : > { %v438_v17 = vpop.f32.mrf.mxu0  ;;  %v503_v32 = vpop.f32.mrf.mxu1 }
  0xa1   : > { %v548_v18 = vpack.c.bf16 %v438_v17, %v436_v16  ;;  %v561_v44 = vpack.c.bf16 %v503_v32, %v501_v30  ;;  %v1534_v16 = vld [vmem:[%s2311_s0 + $0x30] sm:$0xf]  ;;  %v1756_v17 = vld [vmem:[%s2311_s0 + $0x34] sm:$0xf0]  ;;  %v1536_v32 = vld [vmem:[%s2311_s0 + $0x38] sm:$0xf0] }
  0xa8   : > { %v441_v20 = vpop.f32.mrf.mxu0  ;;  %v506_v34 = vpop.f32.mrf.mxu1 }
  0xab   : > { %1501 = vmatmul.msk.bf16.gmra.mxu0 %vm378_vm0, %v1738_v19  ;;  %v1751_v19 = vld [vmem:[%s2311_s0 + $0x14] sm:$0xf] }
  0xb0   : > { %v443_v21 = vpop.f32.mrf.mxu0  ;;  %v508_v36 = vpop.f32.mrf.mxu1 }
  0xb1   : > { %v562_v43 = vpack.c.bf16 %v508_v36, %v506_v34  ;;  %v549_v55 = vpack.c.bf16 %v443_v21, %v441_v20  ;;  %v1520_v20 = vld [vmem:[%s2311_s0 + $0x18] sm:$0xf0]  ;;  %v1558_v34 = vld [vmem:[%s2311_s0 + $0x60] sm:$0xf] }
  0xb2   : > { %v1523_v21 = vor.u32 %v1751_v19, %v1520_v20 }
  0xb8   : > { %v446_v23 = vpop.f32.mrf.mxu0  ;;  %v511_v38 = vpop.f32.mrf.mxu1 }
  0xbb   : > { %1502 = vmatmul.msk.bf16.gmra.mxu0 %vm378_vm0, %v1739_v22  ;;  %v1542_v22 = vld [vmem:[%s2311_s0 + $0x40] sm:$0xf] }
  0xc0   : > { %v448_v24 = vpop.f32.mrf.mxu0  ;;  %v513_v40 = vpop.f32.mrf.mxu1 }
  0xc1   : > { %v563_v41 = vpack.c.bf16 %v513_v40, %v511_v38  ;;  %v550_v53 = vpack.c.bf16 %v448_v24, %v446_v23  ;;  %v1758_v23 = vld [vmem:[%s2311_s0 + $0x44] sm:$0xf0]  ;;  %v1544_v38 = vld [vmem:[%s2311_s0 + $0x48] sm:$0xf0]  ;;  %v1566_v40 = vld [vmem:[%s2311_s0 + $0x70] sm:$0xf] }
  0xc2   : > { %v1543_v24 = vor.u32 %v1758_v23, %v1542_v22 }
  0xc3   : > { %817 = vmatpush.bf16.msra.mxu2 %v563_v41  ;;  %v1764_v41 = vld [vmem:[%s2311_s0 + $0x74] sm:$0xf0] }
  0xc7   : > { %818 = vmatpush.bf16.msra.mxu2 %v562_v43  ;;  %v1759_v43 = vld [vmem:[%s2311_s0 + $0x54] sm:$0xf] }
  0xc8   : > { %v451_v26 = vpop.f32.mrf.mxu0 }
  0xcb   : > { %1503 = vmatmul.msk.bf16.gmra.mxu0 %vm378_vm0, %v1740_v25  ;;  %819 = vmatpush.bf16.msra.mxu2 %v561_v44  ;;  %v1753_v25 = vld [vmem:[%s2311_s0 + $0x24] sm:$0xf]  ;;  %v1552_v44 = vld [vmem:[%s2311_s0 + $0x58] sm:$0xf0] }
  0xd0   : > { %v453_v27 = vpop.f32.mrf.mxu0 }
  0xd1   : > { %v551_v52 = vpack.c.bf16 %v453_v27, %v451_v26  ;;  %v1528_v26 = vld [vmem:[%s2311_s0 + $0x28] sm:$0xf0] }
  0xd2   : > { %v1531_v27 = vor.u32 %v1753_v25, %v1528_v26 }
  0xd8   : > { %v456_v29 = vpop.f32.mrf.mxu0 }
  0xdb   : > { %1504 = vmatmul.msk.bf16.gmra.mxu0 %vm378_vm0, %v1741_v28  ;;  %v1550_v28 = vld [vmem:[%s2311_s0 + $0x50] sm:$0xf] }
  0xe0   : > { %v458_v31 = vpop.f32.mrf.mxu0 }
  0xe1   : > { %v552_v50 = vpack.c.bf16 %v458_v31, %v456_v29  ;;  %v1760_v29 = vld [vmem:[%s2311_s0 + $0x54] sm:$0xf0]  ;;  %v1755_v31 = vld [vmem:[%s2311_s0 + $0x34] sm:$0xf] }
  0xe2   : > { %v1551_v30 = vor.u32 %v1760_v29, %v1550_v28  ;;  %v1592_v28 = vld [vmem:[%s2311_s0 + $0xa8] sm:$0xf0] }
  0xe8   : > { %v461_v33 = vpop.f32.mrf.mxu0 }
  0xf0   : > { %v463_v35 = vpop.f32.mrf.mxu0 }
  0xf1   : > { %v553_v49 = vpack.c.bf16 %v463_v35, %v461_v33  ;;  %v1539_v33 = vor.u32 %v1755_v31, %v1536_v32  ;;  %v1762_v35 = vld [vmem:[%s2311_s0 + $0x64] sm:$0xf0]  ;;  %v1606_v31 = vld [vmem:[%s2311_s0 + $0xc0] sm:$0xf] }
  0xf2   : > { %v1559_v36 = vor.u32 %v1762_v35, %v1558_v34  ;;  %v1774_v32 = vld [vmem:[%s2311_s0 + $0xc4] sm:$0xf0] }
  0xf3   : > { %v1607_v34 = vor.u32 %v1774_v32, %v1606_v31 }
  0xf8   : > { %v466_v37 = vpop.f32.mrf.mxu0 }
 0x100   : > { %v468_v39 = vpop.f32.mrf.mxu0 }
 0x101   : > { %v554_v47 = vpack.c.bf16 %v468_v39, %v466_v37  ;;  %v1757_v37 = vld [vmem:[%s2311_s0 + $0x44] sm:$0xf] }
 0x102   : > { %v1547_v39 = vor.u32 %v1757_v37, %v1544_v38  ;;  %v1781_v38 = vld [vmem:[%s2315_s4] sm:$0xff] }
 0x108   : > { %v471_v42 = vpop.f32.mrf.mxu0 }
 0x110   : > { %v473_v45 = vpop.f32.mrf.mxu0 }
 0x111   : > { %v555_v46 = vpack.c.bf16 %v473_v45, %v471_v42  ;;  %v1567_v42 = vor.u32 %v1764_v41, %v1566_v40  ;;  %v1555_v45 = vor.u32 %v1759_v43, %v1552_v44 }
 0x113   : > { %728 = vmatpush.bf16.msrb.mxu1 %v555_v46  ;;  %v1574_v46 = vld [vmem:[%s2311_s0 + $0x80] sm:$0xf] }
 0x117   : > { %729 = vmatpush.bf16.msrb.mxu1 %v554_v47  ;;  %v1766_v47 = vld [vmem:[%s2311_s0 + $0x84] sm:$0xf0] }
 0x118   : > { %v476_v48 = vpop.f32.mrf.mxu0 }
 0x11b   : > { %730 = vmatpush.bf16.msrb.mxu1 %v553_v49  ;;  %v1761_v49 = vld [vmem:[%s2311_s0 + $0x64] sm:$0xf] }
 0x11f   : > { %731 = vmatpush.bf16.msrb.mxu1 %v552_v50  ;;  %v1560_v50 = vld [vmem:[%s2311_s0 + $0x68] sm:$0xf0] }
 0x120   : > { %v478_v51 = vpop.f32.mrf.mxu0 }
 0x121   : > { %v556_v14 = vpack.c.bf16 %v478_v51, %v476_v48  ;;  %v1575_v48 = vor.u32 %v1766_v47, %v1574_v46  ;;  %v1771_v46 = vld [vmem:[%s2311_s0 + $0xb4] sm:$0xf]  ;;  %v1600_v47 = vld [vmem:[%s2311_s0 + $0xb8] sm:$0xf0] }
 0x123   : > { %732 = vmatpush.bf16.msrb.mxu1 %v551_v52  ;;  %v1563_v52 = vor.u32 %v1761_v49, %v1560_v50  ;;  %v1614_v49 = vld [vmem:[%s2311_s0 + $0xd0] sm:$0xf]  ;;  %v1776_v50 = vld [vmem:[%s2311_s0 + $0xd4] sm:$0xf0] }
 0x127   : > { %733 = vmatpush.bf16.msrb.mxu1 %v550_v53 }
 0x128   : > { %v481_v54 = vpop.f32.mrf.mxu0 }
 0x12b   : > { %734 = vmatpush.bf16.msrb.mxu1 %v549_v55  ;;  %v1568_v55 = vld [vmem:[%s2311_s0 + $0x78] sm:$0xf0] }
 0x12f   : > { %735 = vmatpush.bf16.msrb.mxu1 %v548_v18  ;;  %v1535_v18 = vor.u32 %v1756_v17, %v1534_v16 }
 0x130   : > { %v483_v56 = vpop.f32.mrf.mxu0 }
 0x131   : > { %v557_v10 = vpack.c.bf16 %v483_v56, %v481_v54  ;;  %v1763_v54 = vld [vmem:[%s2311_s0 + $0x74] sm:$0xf] }
 0x132   : > { %736 = vmatmul.bf16.vlgmr.msrb.gmra.mxu1 %v1511_v63  ;;  %v1571_v60 = vor.u32 %v1763_v54, %v1568_v55  ;;  %v1576_v63 = vld [vmem:[%s2311_s0 + $0x88] sm:$0xf0]  ;;  %v1603_v55 = vor.u32 %v1771_v46, %v1600_v47 }
 0x138   : > { %v486_v57 = vpop.f32.mrf.mxu0 }
 0x140   : > { %v488_v58 = vpop.f32.mrf.mxu0 }
 0x141   : > { %v558_v7 = vpack.c.bf16 %v488_v58, %v486_v57  ;;  %v1582_v57 = vld [vmem:[%s2311_s0 + $0x90] sm:$0xf]  ;;  %v1768_v58 = vld [vmem:[%s2311_s0 + $0x94] sm:$0xf0] }
 0x142   : > { %741 = vmatmul.bf16.gmra.mxu1 %v1519_v3  ;;  %v1591_v3 = vor.u32 %v1770_v2, %v1590_v1  ;;  %v1622_v1 = vld [vmem:[%s2311_s0 + $0xe0] sm:$0xf]  ;;  %v1778_v2 = vld [vmem:[%s2311_s0 + $0xe4] sm:$0xf0] }
 0x148   : > { %v491_v59 = vpop.f32.mrf.mxu0 }
 0x150   : > { %v493_v62 = vpop.f32.mrf.mxu0 }
 0x151   : > { %v559_v6 = vpack.c.bf16 %v493_v62, %v491_v59  ;;  %v1583_v59 = vor.u32 %v1768_v58, %v1582_v57  ;;  %v1765_v62 = vld [vmem:[%s2311_s0 + $0x84] sm:$0xf] }
 0x152   : > { %746 = vmatmul.bf16.gmra.mxu1 %v1527_v11  ;;  %v1584_v11 = vld [vmem:[%s2311_s0 + $0x98] sm:$0xf0] }
 0x158   : > { %v496_v0 = vpop.f32.mrf.mxu0 }
 0x160   : > { %v498_v4 = vpop.f32.mrf.mxu0 }
 0x161   : > { %v560_v5 = vpack.c.bf16 %v498_v4, %v496_v0  ;;  %v2066_v4 = vld [vmem:[%s2314_s3] ss:$0 sm:$0xff] }
 0x162   : > { %751 = vmatmul.bf16.gmra.mxu1 %v1535_v18 }
 0x163   : > { %820 = vmatpush.bf16.msra.mxu2 %v560_v5  ;;  %v1579_v5 = vor.u32 %v1765_v62, %v1576_v63  ;;  %v1773_v62 = vld [vmem:[%s2311_s0 + $0xc4] sm:$0xf]  ;;  %v1608_v63 = vld [vmem:[%s2311_s0 + $0xc8] sm:$0xf0] }
 0x167   : > { %821 = vmatpush.bf16.msra.mxu2 %v559_v6 }
 0x16b   : > { %822 = vmatpush.bf16.msra.mxu2 %v558_v7 }
 0x16f   : > { %823 = vmatpush.bf16.msra.mxu2 %v557_v10  ;;  %v1767_v10 = vld [vmem:[%s2311_s0 + $0x94] sm:$0xf] }
 0x170   : > { %v1587_v19 = vor.u32 %v1767_v10, %v1584_v11 }
 0x172   : > { %756 = vmatmul.bf16.gmra.mxu1 %v1543_v24 }
 0x173   : > { %824 = vmatpush.bf16.msra.mxu2 %v556_v14  ;;  %v1772_v14 = vld [vmem:[%s2311_s0 + $0xb4] sm:$0xf0] }
 0x174   : > { %v1599_v16 = vor.u32 %v1772_v14, %v1598_v13 }
 0x176   : > { %825 = vmatmul.bf16.vlgmr.msra.gmra.mxu2 %v1515_v15 }
 0x182   : > { %761 = vmatmul.bf16.gmra.mxu1 %v1551_v30  ;;  %v1782_v30 = vld [vmem:[%s2315_s4 + $0x8] sm:$0xff] }
 0x183   : > { %1804 = vmatpush.bf16.msra.mxu3 %v1782_v30  ;;  %1025 = vmatpush.bf16.msrb.mxu2 %v1782_v30 }
 0x186   : > { %830 = vmatmul.bf16.gmra.mxu2 %v1523_v21 }
 0x187   : > { %1805 = vmatpush.bf16.msra.mxu3 %v1781_v38  ;;  %1026 = vmatpush.bf16.msrb.mxu2 %v1781_v38 }
 0x192   : > { %766 = vmatmul.bf16.gmra.mxu1 %v1559_v36 }
 0x196   : > { %835 = vmatmul.bf16.gmra.mxu2 %v1531_v27  ;;  %v1769_v27 = vld [vmem:[%s2311_s0 + $0xa4] sm:$0xf] }
 0x197   : > { %v1595_v37 = vor.u32 %v1769_v27, %v1592_v28 }
 0x1a2   : > { %771 = vmatmul.bf16.gmra.mxu1 %v1567_v42 }
 0x1a6   : > { %840 = vmatmul.bf16.gmra.mxu2 %v1539_v33 }
 0x1af   : > { %v737_v51 = vpop.f32.mrf.mxu1 }
 0x1b0   : > { %v738_v6 = vadd.f32 %v2066_v4, %v737_v51 }
 0x1b2   : > { %776 = vmatmul.bf16.gmra.mxu1 %v1575_v48 }
 0x1b6   : > { %845 = vmatmul.bf16.gmra.mxu2 %v1547_v39 }
 0x1b7   : > { %v739_v53 = vpop.f32.mrf.mxu1 }
 0x1b8   : > { %v740_v15 = vadd.f32 %v2066_v4, %v739_v53 }
 0x1bf   : > { %v742_v56 = vpop.f32.mrf.mxu1 }
 0x1c0   : > { %v743_v22 = vadd.f32 %v2066_v4, %v742_v56 }
 0x1c2   : > { %781 = vmatmul.bf16.gmra.mxu1 %v1583_v59 }
 0x1c6   : > { %850 = vmatmul.bf16.gmra.mxu2 %v1555_v45 }
 0x1c7   : > { %v744_v61 = vpop.f32.mrf.mxu1 }
 0x1c8   : > { %v745_v33 = vadd.f32 %v2066_v4, %v744_v61 }
 0x1cf   : > { %v747_v0 = vpop.f32.mrf.mxu1 }
 0x1d0   : > { %v748_v41 = vadd.f32 %v2066_v4, %v747_v0 }
 0x1d2   : > { %786 = vmatmul.bf16.gmra.mxu1 %v1591_v3 }
 0x1d6   : > { %855 = vmatmul.bf16.gmra.mxu2 %v1563_v52  ;;  %v1615_v52 = vor.u32 %v1776_v50, %v1614_v49  ;;  %v1632_v49 = vld [vmem:[%s2311_s0 + $0xf8] sm:$0xf0] }
 0x1d7   : > { %v749_v7 = vpop.f32.mrf.mxu1 }
 0x1d8   : > { %v750_v51 = vadd.f32 %v2066_v4, %v749_v7 }
 0x1df   : > { %v752_v12 = vpop.f32.mrf.mxu1 }
 0x1e0   : > { %v753_v61 = vadd.f32 %v2066_v4, %v752_v12 }
 0x1e2   : > { %791 = vmatmul.bf16.gmra.mxu1 %v1599_v16  ;;  %v1775_v16 = vld [vmem:[%s2311_s0 + $0xd4] sm:$0xf] }
 0x1e6   : > { %860 = vmatmul.bf16.gmra.mxu2 %v1571_v60 }
 0x1e7   : > { %v754_v24 = vpop.f32.mrf.mxu1 }
 0x1e8   : > { %v755_v3 = vadd.f32 %v2066_v4, %v754_v24 }
 0x1ef   : > { %v757_v29 = vpop.f32.mrf.mxu1 }
 0x1f2   : > { %796 = vmatmul.bf16.gmra.mxu1 %v1607_v34  ;;  %v1777_v34 = vld [vmem:[%s2311_s0 + $0xe4] sm:$0xf] }
 0x1f6   : > { %865 = vmatmul.bf16.gmra.mxu2 %v1579_v5 }
 0x1f7   : > { %v759_v43 = vpop.f32.mrf.mxu1 }
 0x1f9   : > { %v826_v8 = vpop.f32.mrf.mxu2 }
 0x1fa   : > { %v827_v9 = vadd.f32 %v826_v8, %v738_v6  ;;  %v1623_v6 = vor.u32 %v1778_v2, %v1622_v1 }
 0x1fc   : > { %v906_v20 = vmax.f32 %v827_v9, 0.0  ;;  %v1611_v9 = vor.u32 %v1773_v62, %v1608_v63 }
 0x1ff   : > { %v762_v48 = vpop.f32.mrf.mxu1 }
 0x200   : > { %v763_v32 = vadd.f32 %v2066_v4, %v762_v48  ;;  %v1779_v48 = vld [vmem:[%s2311_s0 + $0xf4] sm:$0xf] }
 0x201   : > { %v828_v17 = vpop.f32.mrf.mxu2 }
 0x202   : > { %v829_v18 = vadd.f32 %v828_v17, %v740_v15  ;;  %801 = vmatmul.bf16.gmra.mxu1 %v1615_v52  ;;  %v758_v15 = vadd.f32 %v2066_v4, %v757_v29  ;;  %v1616_v17 = vld [vmem:[%s2311_s0 + $0xd8] sm:$0xf0] }
 0x204   : > { %v907_v21 = vmax.f32 %v829_v18, 0.0  ;;  %v1630_v18 = vld [vmem:[%s2311_s0 + $0xf0] sm:$0xf] }
 0x206   : > { %v2083_v23 = vpack.c.bf16 %v907_v21, %v906_v20  ;;  %870 = vmatmul.bf16.gmra.mxu2 %v1587_v19  ;;  %v1780_v19 = vld [vmem:[%s2311_s0 + $0xf4] sm:$0xf0]  ;;  %v760_v20 = vadd.f32 %v2066_v4, %v759_v43 }
 0x207   : > { %v764_v59 = vpop.f32.mrf.mxu1 }
 0x209   : > { %v831_v25 = vpop.f32.mrf.mxu2 }
 0x20a   : > { %v832_v26 = vadd.f32 %v831_v25, %v743_v22  ;;  %v1631_v22 = vor.u32 %v1780_v19, %v1630_v18 }
 0x20c   : > { %v908_v39 = vmax.f32 %v832_v26, 0.0  ;;  %v1619_v26 = vor.u32 %v1775_v16, %v1616_v17 }
 0x20f   : > { %v767_v0 = vpop.f32.mrf.mxu1 }
 0x210   : > { %v768_v47 = vadd.f32 %v2066_v4, %v767_v0 }
 0x211   : > { %v833_v35 = vpop.f32.mrf.mxu2 }
 0x212   : > { %v834_v36 = vadd.f32 %v833_v35, %v745_v33  ;;  %806 = vmatmul.bf16.gmra.mxu1 %v1623_v6  ;;  %v1624_v35 = vld [vmem:[%s2311_s0 + $0xe8] sm:$0xf0] }
 0x214   : > { %v909_v40 = vmax.f32 %v834_v36, 0.0  ;;  %v765_v36 = vadd.f32 %v2066_v4, %v764_v59 }
 0x216   : > { %v2105_v42 = vpack.c.bf16 %v909_v40, %v908_v39  ;;  %875 = vmatmul.bf16.gmra.mxu2 %v1595_v37  ;;  %v1627_v40 = vor.u32 %v1777_v34, %v1624_v35 }
 0x217   : > { %v769_v14 = vpop.f32.mrf.mxu1 }
 0x218   : > { %v770_v50 = vadd.f32 %v2066_v4, %v769_v14 }
 0x219   : > { %v836_v44 = vpop.f32.mrf.mxu2 }
 0x21a   : > { %v837_v45 = vadd.f32 %v836_v44, %v748_v41 }
 0x21c   : > { %v910_v56 = vmax.f32 %v837_v45, 0.0 }
 0x21f   : > { %v772_v27 = vpop.f32.mrf.mxu1 }
 0x220   : > { %v773_v62 = vadd.f32 %v2066_v4, %v772_v27 }
 0x221   : > { %v838_v53 = vpop.f32.mrf.mxu2 }
 0x222   : > { %v839_v54 = vadd.f32 %v838_v53, %v750_v51  ;;  %811 = vmatmul.bf16.gmra.mxu1 %v1631_v22 }
 0x224   : > { %v911_v57 = vmax.f32 %v839_v54, 0.0 }
 0x226   : > { %v2120_v58 = vpack.c.bf16 %v911_v57, %v910_v56  ;;  %880 = vmatmul.bf16.gmra.mxu2 %v1603_v55  ;;  %v1635_v55 = vor.u32 %v1779_v48, %v1632_v49 }
 0x227   : > { %v774_v33 = vpop.f32.mrf.mxu1 }
 0x228   : > { %v775_v63 = vadd.f32 %v2066_v4, %v774_v33 }
 0x229   : > { %v841_v60 = vpop.f32.mrf.mxu2 }
 0x22a   : > { %v842_v5 = vadd.f32 %v841_v60, %v753_v61 }
 0x22c   : > { %v912_v10 = vmax.f32 %v842_v5, 0.0 }
 0x22f   : > { %v777_v45 = vpop.f32.mrf.mxu1 }
 0x231   : > { %v843_v7 = vpop.f32.mrf.mxu2 }
 0x232   : > { %v844_v8 = vadd.f32 %v843_v7, %v755_v3 }
 0x234   : > { %v913_v11 = vmax.f32 %v844_v8, 0.0 }
 0x236   : > { %885 = vmatmul.bf16.gmra.mxu2 %v1611_v9  ;;  %v941_v12 = vpack.c.bf16 %v913_v11, %v912_v10  ;;  %v778_v9 = vadd.f32 %v2066_v4, %v777_v45 }
 0x237   : > { %v779_v53 = vpop.f32.mrf.mxu1 }
 0x238   : > { %1647 = vmatmul.msk.bf16.vlgmr.msra.gmra.mxu3 %vm970_vm1, %v941_v12  ;;  %v780_v11 = vadd.f32 %v2066_v4, %v779_v53 }
 0x239   : > { %v846_v13 = vpop.f32.mrf.mxu2 }
 0x23a   : > { %v847_v21 = vadd.f32 %v846_v13, %v758_v15 }
 0x23c   : > { %v914_v28 = vmax.f32 %v847_v21, 0.0 }
 0x23f   : > { %v782_v61 = vpop.f32.mrf.mxu1 }
 0x240   : > { %v783_v19 = vadd.f32 %v2066_v4, %v782_v61 }
 0x241   : > { %v848_v24 = vpop.f32.mrf.mxu2 }
 0x242   : > { %v849_v25 = vadd.f32 %v848_v24, %v760_v20 }
 0x244   : > { %v915_v29 = vmax.f32 %v849_v25, 0.0 }
 0x246   : > { %890 = vmatmul.bf16.gmra.mxu2 %v1619_v26  ;;  %v942_v30 = vpack.c.bf16 %v915_v29, %v914_v28 }
 0x247   : > { %v784_v6 = vpop.f32.mrf.mxu1 }
 0x248   : > { %1648 = vmatmul.msk.bf16.gmra.mxu3 %vm970_vm1, %v942_v30  ;;  %v785_v20 = vadd.f32 %v2066_v4, %v784_v6 }
 0x249   : > { %v851_v31 = vpop.f32.mrf.mxu2 }
 0x24a   : > { %v852_v37 = vadd.f32 %v851_v31, %v763_v32 }
 0x24c   : > { %v916_v41 = vmax.f32 %v852_v37, 0.0 }
 0x24f   : > { %v787_v10 = vpop.f32.mrf.mxu1 }
 0x250   : > { %v788_v29 = vadd.f32 %v2066_v4, %v787_v10 }
 0x251   : > { %v853_v38 = vpop.f32.mrf.mxu2 }
 0x252   : > { %v854_v39 = vadd.f32 %v853_v38, %v765_v36 }
 0x254   : > { %v917_v43 = vmax.f32 %v854_v39, 0.0 }
 0x256   : > { %895 = vmatmul.bf16.gmra.mxu2 %v1627_v40  ;;  %v943_v44 = vpack.c.bf16 %v917_v43, %v916_v41 }
 0x257   : > { %v789_v18 = vpop.f32.mrf.mxu1 }
 0x258   : > { %1649 = vmatmul.msk.bf16.gmra.mxu3 %vm970_vm1, %v943_v44  ;;  %v790_v31 = vadd.f32 %v2066_v4, %v789_v18 }
 0x259   : > { %v856_v46 = vpop.f32.mrf.mxu2 }
 0x25a   : > { %v857_v51 = vadd.f32 %v856_v46, %v768_v47 }
 0x25c   : > { %v918_v56 = vmax.f32 %v857_v51, 0.0 }
 0x25f   : > { %v792_v25 = vpop.f32.mrf.mxu1 }
 0x261   : > { %v858_v52 = vpop.f32.mrf.mxu2 }
 0x262   : > { %v859_v54 = vadd.f32 %v858_v52, %v770_v50 }
 0x264   : > { %v919_v57 = vmax.f32 %v859_v54, 0.0 }
 0x266   : > { %900 = vmatmul.bf16.gmra.mxu2 %v1635_v55  ;;  %v944_v59 = vpack.c.bf16 %v919_v57, %v918_v56 }
 0x267   : > { %v794_v30 = vpop.f32.mrf.mxu1 }
 0x268   : > { %1650 = vmatmul.msk.bf16.gmra.mxu3 %vm970_vm1, %v944_v59  ;;  %v795_v40 = vadd.f32 %v2066_v4, %v794_v30 }
 0x269   : > { %v861_v60 = vpop.f32.mrf.mxu2 }
 0x26a   : > { %v862_v0 = vadd.f32 %v861_v60, %v773_v62 }
 0x26c   : > { %v920_v3 = vmax.f32 %v862_v0, 0.0 }
 0x26f   : > { %v797_v38 = vpop.f32.mrf.mxu1 }
 0x270   : > { %v798_v52 = vadd.f32 %v2066_v4, %v797_v38 }
 0x271   : > { %v863_v1 = vpop.f32.mrf.mxu2 }
 0x272   : > { %v864_v2 = vadd.f32 %v863_v1, %v775_v63 }
 0x274   : > { %v921_v5 = vmax.f32 %v864_v2, 0.0 }
 0x276   : > { %v945_v7 = vpack.c.bf16 %v921_v5, %v920_v3  ;;  %1644 = vmatmul.msk.bf16.vlgmr.msrb.gmra.mxu2 %vm970_vm1, %v2083_v23 }
 0x277   : > { %v799_v44 = vpop.f32.mrf.mxu1 }
 0x278   : > { %1651 = vmatmul.msk.bf16.gmra.mxu3 %vm970_vm1, %v945_v7  ;;  %v800_v53 = vadd.f32 %v2066_v4, %v799_v44 }
 0x279   : > { %v866_v8 = vpop.f32.mrf.mxu2 }
 0x27a   : > { %v867_v12 = vadd.f32 %v866_v8, %v778_v9 }
 0x27c   : > { %v922_v15 = vmax.f32 %v867_v12, 0.0 }
 0x27f   : > { %v802_v51 = vpop.f32.mrf.mxu1 }
 0x280   : > { %v803_v2 = vadd.f32 %v2066_v4, %v802_v51 }
 0x281   : > { %v868_v13 = vpop.f32.mrf.mxu2 }
 0x282   : > { %v869_v14 = vadd.f32 %v868_v13, %v780_v11 }
 0x284   : > { %v923_v16 = vmax.f32 %v869_v14, 0.0 }
 0x286   : > { %v946_v17 = vpack.c.bf16 %v923_v16, %v922_v15  ;;  %1645 = vmatmul.msk.bf16.gmra.mxu2 %vm970_vm1, %v2105_v42 }
 0x287   : > { %v804_v62 = vpop.f32.mrf.mxu1 }
 0x288   : > { %1652 = vmatmul.msk.bf16.gmra.mxu3 %vm970_vm1, %v946_v17  ;;  %v805_v5 = vadd.f32 %v2066_v4, %v804_v62 }
 0x289   : > { %v871_v23 = vpop.f32.mrf.mxu2 }
 0x28a   : > { %v872_v21 = vadd.f32 %v871_v23, %v783_v19 }
 0x28c   : > { %v924_v26 = vmax.f32 %v872_v21, 0.0 }
 0x28f   : > { %v807_v3 = vpop.f32.mrf.mxu1 }
 0x290   : > { %v808_v16 = vadd.f32 %v2066_v4, %v807_v3 }
 0x291   : > { %v873_v22 = vpop.f32.mrf.mxu2 }
 0x292   : > { %v874_v24 = vadd.f32 %v873_v22, %v785_v20 }
 0x294   : > { %v925_v27 = vmax.f32 %v874_v24, 0.0 }
 0x296   : > { %v947_v28 = vpack.c.bf16 %v925_v27, %v924_v26  ;;  %1646 = vmatmul.msk.bf16.gmra.mxu2 %vm970_vm1, %v2120_v58  ;;  %v793_v58 = vadd.f32 %v2066_v4, %v792_v25 }
 0x297   : > { %v809_v13 = vpop.f32.mrf.mxu1 }
 0x298   : > { %1653 = vmatmul.msk.bf16.gmra.mxu3 %vm970_vm1, %v947_v28  ;;  %v810_v17 = vadd.f32 %v2066_v4, %v809_v13 }
 0x299   : > { %v876_v42 = vpop.f32.mrf.mxu2 }
 0x29a   : > { %v877_v32 = vadd.f32 %v876_v42, %v788_v29 }
 0x29c   : > { %v926_v35 = vmax.f32 %v877_v32, 0.0 }
 0x29f   : > { %v812_v20 = vpop.f32.mrf.mxu1 }
 0x2a0   : > { %v813_v28 = vadd.f32 %v2066_v4, %v812_v20  ;;  %v1784_v20 = vld [vmem:[%s2214_s24 + $0x4] sm:$0xf] }
 0x2a1   : > { %v878_v33 = vpop.f32.mrf.mxu2 }
 0x2a2   : > { %v879_v34 = vadd.f32 %v878_v33, %v790_v31 }
 0x2a4   : > { %v927_v36 = vmax.f32 %v879_v34, 0.0 }
 0x2a6   : > { %v948_v37 = vpack.c.bf16 %v927_v36, %v926_v35 }
 0x2a7   : > { %v814_v42 = vpop.f32.mrf.mxu1 }
 0x2a8   : > { %1654 = vmatmul.msk.bf16.gmra.mxu3 %vm970_vm1, %v948_v37  ;;  %v815_v29 = vadd.f32 %v2066_v4, %v814_v42  ;;  %v1675_v42 = vld [vmem:[%s2214_s24 + $0x18] sm:$0xf0] }
 0x2a9   : > { %v881_v39 = vpop.f32.mrf.mxu2 }
 0x2aa   : > { %v882_v41 = vadd.f32 %v881_v39, %v793_v58 }
 0x2ac   : > { %v928_v46 = vmax.f32 %v882_v41, 0.0 }
 0x2b1   : > { %v883_v43 = vpop.f32.mrf.mxu2 }
 0x2b2   : > { %v884_v45 = vadd.f32 %v883_v43, %v795_v40 }
 0x2b4   : > { %v929_v47 = vmax.f32 %v884_v45, 0.0 }
 0x2b6   : > { %v949_v48 = vpack.c.bf16 %v929_v47, %v928_v46 }
 0x2b8   : > { %1655 = vmatmul.msk.bf16.gmra.mxu3 %vm970_vm1, %v949_v48 }
 0x2b9   : > { %v886_v49 = vpop.f32.mrf.mxu2 }
 0x2ba   : > { %v887_v54 = vadd.f32 %v886_v49, %v798_v52 }
 0x2bb   : > { %v2191_v50 = vpop.f32.mrf.mxu3 }
 0x2bc   : > { %v930_v59 = vmax.f32 %v887_v54, 0.0 }
 0x2c1   : > { %v888_v55 = vpop.f32.mrf.mxu2 }
 0x2c2   : > { %v889_v56 = vadd.f32 %v888_v55, %v800_v53 }
 0x2c3   : > { %v2195_v57 = vpop.f32.mrf.mxu3 }
 0x2c4   : > { %v931_v60 = vmax.f32 %v889_v56, 0.0  ;;  %v1133_v61 = vpack.c.bf16 %v2195_v57, %v2191_v50 }
 0x2c6   : > { %v950_v63 = vpack.c.bf16 %v931_v60, %v930_v59 }
 0x2c8   : > { %1656 = vmatmul.msk.bf16.gmra.mxu3 %vm970_vm1, %v950_v63 }
 0x2c9   : > { %v891_v0 = vpop.f32.mrf.mxu2 }
 0x2ca   : > { %v892_v6 = vadd.f32 %v891_v0, %v803_v2  ;;  %v1785_v2 = vld [vmem:[%s2214_s24 + $0x4] sm:$0xf0] }
 0x2cb   : > { %v1048_v1 = vpop.f32.mrf.mxu3 }
 0x2cc   : > { %v932_v10 = vmax.f32 %v892_v6, 0.0 }
 0x2d1   : > { %v893_v7 = vpop.f32.mrf.mxu2 }
 0x2d2   : > { %v894_v8 = vadd.f32 %v893_v7, %v805_v5  ;;  %v1673_v7 = vld [vmem:[%s2214_s24 + $0x10] sm:$0xf] }
 0x2d3   : > { %v1050_v9 = vpop.f32.mrf.mxu3 }
 0x2d4   : > { %v933_v11 = vmax.f32 %v894_v8, 0.0  ;;  %v1134_v45 = vpack.c.bf16 %v1050_v9, %v1048_v1  ;;  %v1665_v1 = vld [vmem:[%s2214_s24] sm:$0xf]  ;;  %v1787_v9 = vld [vmem:[%s2214_s24 + $0x14] sm:$0xf0] }
 0x2d5   : > { %v1666_v5 = vor.u32 %v1785_v2, %v1665_v1 }
 0x2d6   : > { %v951_v12 = vpack.c.bf16 %v933_v11, %v932_v10  ;;  %v1674_v11 = vor.u32 %v1787_v9, %v1673_v7 }
 0x2d8   : > { %1657 = vmatmul.msk.bf16.gmra.mxu3 %vm970_vm1, %v951_v12 }
 0x2d9   : > { %v896_v14 = vpop.f32.mrf.mxu2 }
 0x2da   : > { %v897_v23 = vadd.f32 %v896_v14, %v808_v16  ;;  %v1789_v16 = vld [vmem:[%s2214_s24 + $0x24] sm:$0xf0] }
 0x2db   : > { %v1053_v15 = vpop.f32.mrf.mxu3 }
 0x2dc   : > { %v934_v22 = vmax.f32 %v897_v23, 0.0 }
 0x2e1   : > { %v898_v18 = vpop.f32.mrf.mxu2 }
 0x2e2   : > { %v899_v19 = vadd.f32 %v898_v18, %v810_v17 }
 0x2e3   : > { %v1055_v21 = vpop.f32.mrf.mxu3 }
 0x2e4   : > { %v935_v24 = vmax.f32 %v899_v19, 0.0  ;;  %v1135_v4 = vpack.c.bf16 %v1055_v21, %v1053_v15  ;;  %v1681_v15 = vld [vmem:[%s2214_s24 + $0x20] sm:$0xf]  ;;  %v1667_v21 = vld [vmem:[%s2214_s24 + $0x8] sm:$0xf0] }
 0x2e5   : > { %v1682_v17 = vor.u32 %v1789_v16, %v1681_v15 }
 0x2e6   : > { %v952_v25 = vpack.c.bf16 %v935_v24, %v934_v22  ;;  %v1670_v24 = vor.u32 %v1784_v20, %v1667_v21 }
 0x2e8   : > { %1658 = vmatmul.msk.bf16.gmra.mxu3 %vm970_vm1, %v952_v25  ;;  %v1689_v25 = vld [vmem:[%s2214_s24 + $0x30] sm:$0xf] }
 0x2e9   : > { %v901_v26 = vpop.f32.mrf.mxu2 }
 0x2ea   : > { %v902_v30 = vadd.f32 %v901_v26, %v813_v28  ;;  %v1791_v26 = vld [vmem:[%s2214_s24 + $0x34] sm:$0xf0]  ;;  %v1786_v28 = vld [vmem:[%s2214_s24 + $0x14] sm:$0xf] }
 0x2eb   : > { %v1058_v27 = vpop.f32.mrf.mxu3 }
 0x2ec   : > { %v936_v34 = vmax.f32 %v902_v30, 0.0  ;;  %v1697_v30 = vld [vmem:[%s2214_s24 + $0x40] sm:$0xf] }
 0x2f1   : > { %v903_v31 = vpop.f32.mrf.mxu2 }
 0x2f2   : > { %v904_v32 = vadd.f32 %v903_v31, %v815_v29  ;;  %v1678_v29 = vor.u32 %v1786_v28, %v1675_v42  ;;  %v1793_v31 = vld [vmem:[%s2214_s24 + $0x44] sm:$0xf0] }
 0x2f3   : > { %v1060_v33 = vpop.f32.mrf.mxu3 }
 0x2f4   : > { %v937_v35 = vmax.f32 %v904_v32, 0.0  ;;  %v1136_v41 = vpack.c.bf16 %v1060_v33, %v1058_v27  ;;  %v1690_v27 = vor.u32 %v1791_v26, %v1689_v25  ;;  %v1698_v32 = vor.u32 %v1793_v31, %v1697_v30  ;;  %v1788_v33 = vld [vmem:[%s2214_s24 + $0x24] sm:$0xf] }
 0x2f6   : > { %v953_v36 = vpack.c.bf16 %v937_v35, %v936_v34  ;;  %v1683_v34 = vld [vmem:[%s2214_s24 + $0x28] sm:$0xf0] }
 0x2f7   : > { %v1686_v35 = vor.u32 %v1788_v33, %v1683_v34 }
 0x2f8   : > { %1659 = vmatmul.msk.bf16.gmra.mxu3 %vm970_vm1, %v953_v36  ;;  %v1705_v36 = vld [vmem:[%s2214_s24 + $0x50] sm:$0xf] }
 0x2f9   : > { %v1028_v37 = vpop.f32.mrf.mxu2 }
 0x2fb   : > { %v1063_v38 = vpop.f32.mrf.mxu3 }
 0x301   : > { %v1030_v39 = vpop.f32.mrf.mxu2 }
 0x302   : > { %v1130_v54 = vpack.c.bf16 %v1030_v39, %v1028_v37  ;;  %v1795_v37 = vld [vmem:[%s2214_s24 + $0x54] sm:$0xf0]  ;;  %v1790_v39 = vld [vmem:[%s2214_s24 + $0x34] sm:$0xf] }
 0x303   : > { %v1065_v58 = vpop.f32.mrf.mxu3 }
 0x304   : > { %v1137_v40 = vpack.c.bf16 %v1065_v58, %v1063_v38  ;;  %v1706_v38 = vor.u32 %v1795_v37, %v1705_v36  ;;  %v1691_v58 = vld [vmem:[%s2214_s24 + $0x38] sm:$0xf0] }
 0x306   : > { %1230 = vmatpush.bf16.msrb.mxu3 %v1137_v40  ;;  %v1694_v40 = vor.u32 %v1790_v39, %v1691_v58 }
 0x309   : > { %v1033_v43 = vpop.f32.mrf.mxu2 }
 0x30a   : > { %1231 = vmatpush.bf16.msrb.mxu3 %v1136_v41  ;;  %v1713_v41 = vld [vmem:[%s2214_s24 + $0x60] sm:$0xf] }
 0x30b   : > { %v1068_v44 = vpop.f32.mrf.mxu3 }
 0x30e   : > { %1232 = vmatpush.bf16.msrb.mxu3 %v1135_v4  ;;  %v1792_v4 = vld [vmem:[%s2214_s24 + $0x44] sm:$0xf] }
 0x311   : > { %v1035_v46 = vpop.f32.mrf.mxu2 }
 0x312   : > { %1233 = vmatpush.bf16.msrb.mxu3 %v1134_v45  ;;  %v1131_v53 = vpack.c.bf16 %v1035_v46, %v1033_v43  ;;  %v1797_v43 = vld [vmem:[%s2214_s24 + $0x64] sm:$0xf0]  ;;  %v1699_v45 = vld [vmem:[%s2214_s24 + $0x48] sm:$0xf0] }
 0x313   : > { %v1070_v47 = vpop.f32.mrf.mxu3  ;;  %v1702_v46 = vor.u32 %v1792_v4, %v1699_v45 }
 0x314   : > { %v1138_v22 = vpack.c.bf16 %v1070_v47, %v1068_v44  ;;  %v1714_v44 = vor.u32 %v1797_v43, %v1713_v41  ;;  %v1721_v47 = vld [vmem:[%s2214_s24 + $0x70] sm:$0xf] }
 0x316   : > { %1234 = vmatpush.bf16.msrb.mxu3 %v1133_v61 }
 0x319   : > { %v1038_v48 = vpop.f32.mrf.mxu2 }
 0x31b   : > { %v1073_v49 = vpop.f32.mrf.mxu3 }
 0x321   : > { %v1040_v50 = vpop.f32.mrf.mxu2 }
 0x322   : > { %v1132_v51 = vpack.c.bf16 %v1040_v50, %v1038_v48  ;;  %v1799_v48 = vld [vmem:[%s2214_s24 + $0x74] sm:$0xf0]  ;;  %v1794_v50 = vld [vmem:[%s2214_s24 + $0x54] sm:$0xf] }
 0x323   : > { %v1075_v52 = vpop.f32.mrf.mxu3 }
 0x324   : > { %1235 = vmatpush.bf16.msrb.mxu3 %v1132_v51  ;;  %v1139_v19 = vpack.c.bf16 %v1075_v52, %v1073_v49  ;;  %v1722_v49 = vor.u32 %v1799_v48, %v1721_v47  ;;  %v1707_v51 = vld [vmem:[%s2214_s24 + $0x58] sm:$0xf0] }
 0x325   : > { %v1710_v52 = vor.u32 %v1794_v50, %v1707_v51 }
 0x328   : > { %1236 = vmatpush.bf16.msrb.mxu3 %v1131_v53  ;;  %v1796_v53 = vld [vmem:[%s2214_s24 + $0x64] sm:$0xf] }
 0x32b   : > { %v1078_v55 = vpop.f32.mrf.mxu3 }
 0x32c   : > { %1237 = vmatpush.bf16.msrb.mxu3 %v1130_v54  ;;  %v1715_v54 = vld [vmem:[%s2214_s24 + $0x68] sm:$0xf0] }
 0x32f   : > { %1238 = vmatmul.bf16.vlgmr.msrb.gmra.mxu3 %v1666_v5 }
 0x333   : > { %v1080_v56 = vpop.f32.mrf.mxu3 }
 0x334   : > { %v1140_v18 = vpack.c.bf16 %v1080_v56, %v1078_v55  ;;  %v1718_v56 = vor.u32 %v1796_v53, %v1715_v54 }
 0x33b   : > { %v1083_v57 = vpop.f32.mrf.mxu3 }
 0x33f   : > { %1243 = vmatmul.bf16.gmra.mxu3 %v1674_v11 }
 0x343   : > { %v1085_v59 = vpop.f32.mrf.mxu3 }
 0x344   : > { %v1141_v23 = vpack.c.bf16 %v1085_v59, %v1083_v57  ;;  %v1798_v59 = vld [vmem:[%s2214_s24 + $0x74] sm:$0xf] }
 0x34b   : > { %v1088_v60 = vpop.f32.mrf.mxu3 }
 0x34f   : > { %1248 = vmatmul.bf16.gmra.mxu3 %v1682_v17 }
 0x353   : > { %v1090_v62 = vpop.f32.mrf.mxu3 }
 0x354   : > { %v1142_v14 = vpack.c.bf16 %v1090_v62, %v1088_v60  ;;  %v1723_v60 = vld [vmem:[%s2214_s24 + $0x78] sm:$0xf0] }
 0x355   : > { %v1726_v62 = vor.u32 %v1798_v59, %v1723_v60 }
 0x35b   : > { %v1093_v63 = vpop.f32.mrf.mxu3 }
 0x35f   : > { %1253 = vmatmul.bf16.gmra.mxu3 %v1690_v27 }
 0x363   : > { %v1095_v0 = vpop.f32.mrf.mxu3 }
 0x364   : > { %v1143_v13 = vpack.c.bf16 %v1095_v0, %v1093_v63  ;;  %v2253_v0 = vld [vmem:[%s2316_s5] ss:$0 sm:$0xff] }
 0x36b   : > { %v1098_v61 = vpop.f32.mrf.mxu3 }
 0x36f   : > { %1258 = vmatmul.bf16.gmra.mxu3 %v1698_v32 }
 0x373   : > { %v1100_v3 = vpop.f32.mrf.mxu3 }
 0x374   : > { %v1144_v12 = vpack.c.bf16 %v1100_v3, %v1098_v61 }
 0x37b   : > { %v1103_v6 = vpop.f32.mrf.mxu3 }
 0x37f   : > { %1263 = vmatmul.bf16.gmra.mxu3 %v1706_v38 }
 0x383   : > { %v1105_v8 = vpop.f32.mrf.mxu3 }
 0x384   : > { %v1145_v10 = vpack.c.bf16 %v1105_v8, %v1103_v6 }
 0x386   : > { %1279 = vmatpush.bf16.msrb.mxu0 %v1145_v10 }
 0x38a   : > { %1280 = vmatpush.bf16.msrb.mxu0 %v1144_v12 }
 0x38e   : > { %1281 = vmatpush.bf16.msrb.mxu0 %v1143_v13 }
 0x38f   : > { %1268 = vmatmul.bf16.gmra.mxu3 %v1714_v44 }
 0x392   : > { %1282 = vmatpush.bf16.msrb.mxu0 %v1142_v14 }
 0x396   : > { %1283 = vmatpush.bf16.msrb.mxu0 %v1141_v23 }
 0x39a   : > { %1284 = vmatpush.bf16.msrb.mxu0 %v1140_v18 }
 0x39e   : > { %1285 = vmatpush.bf16.msrb.mxu0 %v1139_v19 }
 0x39f   : > { %1273 = vmatmul.bf16.gmra.mxu3 %v1722_v49 }
 0x3a2   : > { %1286 = vmatpush.bf16.msrb.mxu0 %v1138_v22 }
 0x3a5   : > { %1287 = vmatmul.bf16.vlgmr.msrb.gmra.mxu0 %v1670_v24 }
 0x3b2   : > { %v1239_v55 = vpop.f32.mrf.mxu3 }
 0x3b3   : > { %v1240_v1 = vadd.f32 %v2253_v0, %v1239_v55 }
 0x3b5   : > { %1292 = vmatmul.bf16.gmra.mxu0 %v1678_v29 }
 0x3ba   : > { %v1241_v57 = vpop.f32.mrf.mxu3 }
 0x3bb   : > { %v1242_v7 = vadd.f32 %v2253_v0, %v1241_v57 }
 0x3c2   : > { %v1244_v63 = vpop.f32.mrf.mxu3 }
 0x3c3   : > { %v1245_v11 = vadd.f32 %v2253_v0, %v1244_v63 }
 0x3c5   : > { %1297 = vmatmul.bf16.gmra.mxu0 %v1686_v35 }
 0x3ca   : > { %v1246_v61 = vpop.f32.mrf.mxu3 }
 0x3cb   : > { %v1247_v16 = vadd.f32 %v2253_v0, %v1246_v61 }
 0x3d2   : > { %v1249_v6 = vpop.f32.mrf.mxu3 }
 0x3d3   : > { %v1250_v20 = vadd.f32 %v2253_v0, %v1249_v6 }
 0x3d5   : > { %1302 = vmatmul.bf16.gmra.mxu0 %v1694_v40 }
 0x3da   : > { %v1251_v13 = vpop.f32.mrf.mxu3 }
 0x3db   : > { %v1252_v26 = vadd.f32 %v2253_v0, %v1251_v13 }
 0x3e2   : > { %v1254_v18 = vpop.f32.mrf.mxu3 }
 0x3e3   : > { %v1255_v29 = vadd.f32 %v2253_v0, %v1254_v18 }
 0x3e5   : > { %1307 = vmatmul.bf16.gmra.mxu0 %v1702_v46 }
 0x3ea   : > { %v1256_v25 = vpop.f32.mrf.mxu3 }
 0x3eb   : > { %v1257_v34 = vadd.f32 %v2253_v0, %v1256_v25 }
 0x3f2   : > { %v1259_v30 = vpop.f32.mrf.mxu3 }
 0x3f3   : > { %v1260_v39 = vadd.f32 %v2253_v0, %v1259_v30 }
 0x3f5   : > { %1312 = vmatmul.bf16.gmra.mxu0 %v1710_v52 }
 0x3fa   : > { %v1261_v36 = vpop.f32.mrf.mxu3 }
 0x3fb   : > { %v1262_v44 = vadd.f32 %v2253_v0, %v1261_v36 }
 0x402   : > { %v1264_v41 = vpop.f32.mrf.mxu3 }
 0x403   : > { %v1265_v48 = vadd.f32 %v2253_v0, %v1264_v41 }
 0x405   : > { %1317 = vmatmul.bf16.gmra.mxu0 %v1718_v56 }
 0x40a   : > { %v1266_v47 = vpop.f32.mrf.mxu3 }
 0x40b   : > { %v1267_v53 = vadd.f32 %v2253_v0, %v1266_v47 }
 0x412   : > { %v1269_v52 = vpop.f32.mrf.mxu3 }
 0x413   : > { %v1270_v57 = vadd.f32 %v2253_v0, %v1269_v52 }
 0x415   : > { %1322 = vmatmul.bf16.gmra.mxu0 %v1726_v62 }
 0x41a   : > { %v1271_v60 = vpop.f32.mrf.mxu3 }
 0x41b   : > { %v1272_v61 = vadd.f32 %v2253_v0, %v1271_v60 }
 0x422   : > { %v1288_v2 = vpop.f32.mrf.mxu0 }
 0x423   : > { %v1289_v3 = vadd.f32 %v1288_v2, %v1240_v1 }
 0x425   : > { %v1328_v5 = vmax.f32 %v1289_v3, 0.0  ;;  %v1274_v3 = vpop.f32.mrf.mxu3 }
 0x426   : > { %v1275_v6 = vadd.f32 %v2253_v0, %v1274_v3 }
 0x427   : > { %1344 = vst.msk [vmem:[%s2259_s7] sm:$0xff] %vm970_vm1, %v1328_v5 }
 0x42a   : > { %v1290_v8 = vpop.f32.mrf.mxu0 }
 0x42b   : > { %v1291_v9 = vadd.f32 %v1290_v8, %v1242_v7 }
 0x42d   : > { %v1329_v10 = vmax.f32 %v1291_v9, 0.0 }
 0x42f   : > { %1345 = vst.msk [vmem:[%s2259_s7 + $0x8] sm:$0xff] %vm970_vm1, %v1329_v10  ;;  %v1276_v10 = vpop.f32.mrf.mxu3 }
 0x432   : > { %v1293_v12 = vpop.f32.mrf.mxu0 }
 0x433   : > { %v1294_v14 = vadd.f32 %v1293_v12, %v1245_v11  ;;  %v1277_v11 = vadd.f32 %v2253_v0, %v1276_v10 }
 0x435   : > { %v1330_v15 = vmax.f32 %v1294_v14, 0.0 }
 0x437   : > { %1346 = vst.msk [vmem:[%s2259_s7 + $0x10] sm:$0xff] %vm970_vm1, %v1330_v15 }
 0x43a   : > { %v1295_v17 = vpop.f32.mrf.mxu0 }
 0x43b   : > { %v1296_v23 = vadd.f32 %v1295_v17, %v1247_v16 }
 0x43d   : > { %v1331_v19 = vmax.f32 %v1296_v23, 0.0 }
 0x43f   : > { %1347 = vst.msk [vmem:[%s2259_s7 + $0x18] sm:$0xff] %vm970_vm1, %v1331_v19 }
 0x442   : > { %v1298_v21 = vpop.f32.mrf.mxu0 }
 0x443   : > { %v1299_v22 = vadd.f32 %v1298_v21, %v1250_v20 }
 0x445   : > { %v1332_v24 = vmax.f32 %v1299_v22, 0.0 }
 0x447   : > { %1348 = vst.msk [vmem:[%s2259_s7 + $0x20] sm:$0xff] %vm970_vm1, %v1332_v24 }
 0x44a   : > { %v1300_v27 = vpop.f32.mrf.mxu0 }
 0x44b   : > { %v1301_v28 = vadd.f32 %v1300_v27, %v1252_v26 }
 0x44d   : > { %v1333_v42 = vmax.f32 %v1301_v28, 0.0 }
 0x44f   : > { %1349 = vst.msk [vmem:[%s2259_s7 + $0x28] sm:$0xff] %vm970_vm1, %v1333_v42 }
 0x452   : > { %v1303_v31 = vpop.f32.mrf.mxu0 }
 0x453   : > { %v1304_v32 = vadd.f32 %v1303_v31, %v1255_v29 }
 0x455   : > { %v1334_v33 = vmax.f32 %v1304_v32, 0.0 }
 0x457   : > { %1350 = vst.msk [vmem:[%s2259_s7 + $0x30] sm:$0xff] %vm970_vm1, %v1334_v33 }
 0x45a   : > { %v1305_v35 = vpop.f32.mrf.mxu0 }
 0x45b   : > { %v1306_v37 = vadd.f32 %v1305_v35, %v1257_v34 }
 0x45d   : > { %v1335_v38 = vmax.f32 %v1306_v37, 0.0 }
 0x45f   : > { %1351 = vst.msk [vmem:[%s2259_s7 + $0x38] sm:$0xff] %vm970_vm1, %v1335_v38 }
 0x462   : > { %v1308_v58 = vpop.f32.mrf.mxu0 }
 0x463   : > { %v1309_v40 = vadd.f32 %v1308_v58, %v1260_v39 }
 0x465   : > { %v1336_v43 = vmax.f32 %v1309_v40, 0.0 }
 0x467   : > { %1352 = vst.msk [vmem:[%s2259_s7 + $0x40] sm:$0xff] %vm970_vm1, %v1336_v43 }
 0x46a   : > { %v1310_v4 = vpop.f32.mrf.mxu0 }
 0x46b   : > { %v1311_v45 = vadd.f32 %v1310_v4, %v1262_v44 }
 0x46d   : > { %v1337_v46 = vmax.f32 %v1311_v45, 0.0 }
 0x46f   : > { %1353 = vst.msk [vmem:[%s2259_s7 + $0x48] sm:$0xff] %vm970_vm1, %v1337_v46 }
 0x472   : > { %v1313_v49 = vpop.f32.mrf.mxu0 }
 0x473   : > { %v1314_v50 = vadd.f32 %v1313_v49, %v1265_v48 }
 0x475   : > { %v1338_v51 = vmax.f32 %v1314_v50, 0.0 }
 0x477   : > { %1354 = vst.msk [vmem:[%s2259_s7 + $0x50] sm:$0xff] %vm970_vm1, %v1338_v51 }
 0x47a   : > { %v1315_v54 = vpop.f32.mrf.mxu0 }
 0x47b   : > { %v1316_v55 = vadd.f32 %v1315_v54, %v1267_v53 }
 0x47d   : > { %v1339_v56 = vmax.f32 %v1316_v55, 0.0 }
 0x47f   : > { %1355 = vst.msk [vmem:[%s2259_s7 + $0x58] sm:$0xff] %vm970_vm1, %v1339_v56 }
 0x482   : > { %v1318_v59 = vpop.f32.mrf.mxu0 }
 0x483   : > { %v1319_v62 = vadd.f32 %v1318_v59, %v1270_v57 }
 0x485   : > { %v1340_v63 = vmax.f32 %v1319_v62, 0.0 }
 0x487   : > { %1356 = vst.msk [vmem:[%s2259_s7 + $0x60] sm:$0xff] %vm970_vm1, %v1340_v63 }
 0x48a   : > { %v1320_v1 = vpop.f32.mrf.mxu0 }
 0x48b   : > { %v1321_v2 = vadd.f32 %v1320_v1, %v1272_v61 }
 0x48d   : > { %v1341_v5 = vmax.f32 %v1321_v2, 0.0 }
 0x48f   : > { %1357 = vst.msk [vmem:[%s2259_s7 + $0x68] sm:$0xff] %vm970_vm1, %v1341_v5 }
 0x492   : > { %v1323_v7 = vpop.f32.mrf.mxu0 }
 0x493   : > { %v1324_v8 = vadd.f32 %v1323_v7, %v1275_v6 }
 0x495   : > { %v1342_v9 = vmax.f32 %v1324_v8, 0.0 }
 0x497   : > { %1358 = vst.msk [vmem:[%s2259_s7 + $0x70] sm:$0xff] %vm970_vm1, %v1342_v9 }
 0x49a   : > { %v1325_v12 = vpop.f32.mrf.mxu0 }
 0x49b   : > { %v1326_v13 = vadd.f32 %v1325_v12, %v1277_v11 }
 0x49d   : > { %v1343_v14 = vmax.f32 %v1326_v13, 0.0 }
 0x49f   : > { %1359 = vst.msk [vmem:[%s2259_s7 + $0x78] sm:$0xff] %vm970_vm1, %v1343_v14 }
 0x4a0 PF: > { %s16_s21 = sadd.s32 1, %s1822_s21  }
 0x4a1   : > { %p13_p4 = scmp.ge.s32.totalorder %s16_s21, 4  }
 0x4a3   :  { %15 = sbr.rel (!%p13_p4) target bundleno = 1 (0x1), region = 72 }

</bundles_post_ra>
